<compile_context>
chip_gen: v5e
topology: v5e:2x2
jax: 0.10.0
libtpu: 0.0.40
codegen_flags: <defaults>
</compile_context>

<pallas_src>
import jax
import jax.numpy as jnp
from jax.experimental import pallas as pl
from jax.experimental.pallas import tpu as pltpu


# Dtypes the Pallas copy paths are validated for (whole-byte, standard packing).
_PALLAS_COPY_DTYPES = {
    jnp.dtype(jnp.float32), jnp.dtype(jnp.bfloat16), jnp.dtype(jnp.float16),
    jnp.dtype(jnp.int32), jnp.dtype(jnp.uint32),
    jnp.dtype(jnp.int16), jnp.dtype(jnp.uint16),
    jnp.dtype(jnp.int8), jnp.dtype(jnp.uint8),
}


def _choose_lane_width(numel):
    """Largest lane-dense width 128*k (k in {8,4,2,1}) dividing numel, else None."""
    for k in (8, 4, 2, 1):
        lane = 128 * k
        if numel % lane == 0:
            return lane
    return None


# ---------------------------------------------------------------------------
# Forced-copy path A: direct HBM->HBM DMA (no VMEM round-trip)
# ---------------------------------------------------------------------------
def _dma_copy_kernel(x_hbm, o_hbm, sem):
    cp = pltpu.make_async_copy(x_hbm, o_hbm, sem)
    cp.start()
    cp.wait()


def _pallas_hbm_copy_2d(x2d):
    """Copy a lane-dense (R, 128*k) slab with a single HBM->HBM DMA."""
    R, L = x2d.shape
    itemsize = jnp.dtype(x2d.dtype).itemsize
    return pl.pallas_call(
        _dma_copy_kernel,
        out_shape=jax.ShapeDtypeStruct((R, L), x2d.dtype),
        in_specs=[pl.BlockSpec(memory_space=pl.ANY)],
        out_specs=pl.BlockSpec(memory_space=pl.ANY),
        scratch_shapes=[pltpu.SemaphoreType.DMA],
        cost_estimate=pl.CostEstimate(
            flops=0, transcendentals=0, bytes_accessed=2 * R * L * itemsize),
    )(x2d)


# ---------------------------------------------------------------------------
# Forced-copy path B: blocked VMEM round-trip (generation-safe block sizing)
# ---------------------------------------------------------------------------
def _copy_kernel(x_ref, o_ref):
    o_ref[...] = x_ref[...]


def _pallas_vmem_copy_2d(x2d, donate=False):
    """Copy a lane-dense (R, 128*k) slab through VMEM with a tiled Pallas kernel."""
    R, L = x2d.shape
    itemsize = jnp.dtype(x2d.dtype).itemsize
    # Packed sublane count: 8 for 32-bit, 16 for bf16/f16, 32 for int8.
    sublane = max(8, 32 // itemsize)

    # ~8 MiB blocks: double-buffered input + output = 4x block = 32 MiB, which
    # sits comfortably inside the explicit 48 MiB scoped-VMEM limit below on
    # every generation (v5e/v6e: 128 MiB physical, v7x: 64 MiB per TC), while
    # amortizing the ~0.35 us/grid-step overhead to a few percent of roofline.
    target_bytes = 8 << 20
    rows_target = max(sublane, (target_bytes // (L * itemsize)) // sublane * sublane)

    if R <= rows_target:
        if R >= 2 * sublane and R % sublane == 0:
            # Split into >=2 roughly even, sublane-aligned blocks so that on
            # v7x both TensorCores get work under "parallel" semantics.
            rows_per_block = pl.cdiv(pl.cdiv(R, 2), sublane) * sublane
        else:
            # Whole (small) array in one block; block_shape == array dims is
            # always legal regardless of sublane divisibility.
            rows_per_block = R
    else:
        rows_per_block = rows_target

    grid = (pl.cdiv(R, rows_per_block),)

    return pl.pallas_call(
        _copy_kernel,
        out_shape=jax.ShapeDtypeStruct((R, L), x2d.dtype),
        grid_spec=pltpu.PrefetchScalarGridSpec(
            num_scalar_prefetch=0,
            grid=grid,
            in_specs=[pl.BlockSpec((rows_per_block, L), lambda i: (i, 0))],
            out_specs=pl.BlockSpec((rows_per_block, L), lambda i: (i, 0)),
        ),
        compiler_params=pltpu.CompilerParams(
            dimension_semantics=("parallel",),   # v7x: shard blocks across both TCs
            vmem_limit_bytes=48 << 20,           # explicit; safe on v5e/v6e/v7x
        ),
        cost_estimate=pl.CostEstimate(
            flops=0, transcendentals=0, bytes_accessed=2 * R * L * itemsize),
        # Optional: reuse the input HBM buffer for the output (halves peak HBM
        # footprint) when the caller has donated x and no longer needs it.
        input_output_aliases=({0: 0} if donate else {}),
    )(x2d)


# ---------------------------------------------------------------------------
# Module equivalent
# ---------------------------------------------------------------------------
class Reshape:
    """JAX/Pallas equivalent of the PyTorch Reshape(nn.Module).

    copy_mode:
      "none" (default) - pure-metadata reshape, identical semantics to
                         torch .view() on a contiguous tensor (optimal).
      "dma"            - materializing copy via a direct HBM->HBM Pallas DMA.
      "vmem"           - materializing copy via a blocked VMEM Pallas kernel.
    """

    def __init__(self, *args, copy_mode="none"):
        assert copy_mode in ("none", "dma", "vmem")
        self.shape = args
        self.copy_mode = copy_mode

    def _resolve_shape(self, numel):
        shape = list(self.shape)
        neg = [i for i, s in enumerate(shape) if s == -1]
        if len(neg) > 1:
            raise ValueError("only one -1 allowed in shape")
        known = 1
        for s in shape:
            if s != -1:
                known *= s
        if neg:
            if known == 0 or numel % known != 0:
                raise ValueError(
                    f"cannot view {numel} elements as shape {tuple(self.shape)}")
            shape[neg[0]] = numel // known
        elif known != numel:
            raise ValueError(
                f"cannot view {numel} elements as shape {tuple(self.shape)}")
        return tuple(shape)

    def __call__(self, x):
        numel = x.size
        target = self._resolve_shape(numel)

        if self.copy_mode == "none":
            # Fast path (recommended): metadata-only, matches torch .view().
            return jnp.reshape(x, target)

        lane = _choose_lane_width(numel)
        if lane is None or jnp.dtype(x.dtype) not in _PALLAS_COPY_DTYPES:
            # TODO(synk): sizes not divisible by 128 and sub-byte dtypes take
            # the metadata path (no validated lane-dense slab for the copy).
            return jnp.reshape(x, target)

        # Flatten (metadata-only, row-major => same element order as torch
        # .view on a contiguous tensor) to a wide lane-dense slab, copy it
        # through the Pallas kernel, reshape (metadata-only) to the target.
        x2d = jnp.reshape(x, (numel // lane, lane))
        if self.copy_mode == "dma":
            y2d = _pallas_hbm_copy_2d(x2d)
        else:
            y2d = _pallas_vmem_copy_2d(x2d)
        return jnp.reshape(y2d, target)


# ---------------------------------------------------------------------------
# Demo
# ---------------------------------------------------------------------------
if __name__ == "__main__":
    key = jax.random.PRNGKey(0)
    # Input consistent with a typical CNN encoder feature map: NCHW
    x = jax.random.normal(key, (2, 4, 16, 16), dtype=jnp.float32)
    ref = jnp.reshape(x, (2, -1))

    # 1) Default path: metadata-only reshape (the optimal implementation).
    y_fast = jax.block_until_ready(Reshape(2, -1)(x))
    assert y_fast.shape == (2, 4 * 16 * 16), y_fast.shape
    assert y_fast.dtype == x.dtype
    assert bool(jnp.array_equal(y_fast, ref))

    # 2) Forced materializing copy via direct HBM->HBM DMA Pallas kernel.
    y_dma = jax.block_until_ready(Reshape(2, -1, copy_mode="dma")(x))
    assert y_dma.shape == (2, 4 * 16 * 16), y_dma.shape
    assert y_dma.dtype == x.dtype
    assert bool(jnp.array_equal(y_dma, ref))

    # 3) Forced materializing copy via blocked VMEM Pallas kernel.
    y_vmem = jax.block_until_ready(Reshape(2, -1, copy_mode="vmem")(x))
    assert y_vmem.shape == (2, 4 * 16 * 16), y_vmem.shape
    assert y_vmem.dtype == x.dtype
    assert bool(jnp.array_equal(y_vmem, ref))

    print("KERNEL_OK")
</pallas_src>

<mosaic_0001>
module attributes {stable_mosaic.version = 11 : i64} {
  func.func @_dma_copy_kernel(%arg0: memref<2x1024xf32, #tpu.memory_space<any>>, %arg1: memref<2x1024xf32, #tpu.memory_space<any>>, %arg2: memref<!tpu.dma_semaphore, #tpu.memory_space<semaphore_mem>>) attributes {dimension_semantics = [], scalar_prefetch = 0 : i64, scratch_operands = 1 : i64, tpu.core_type = #tpu.core_type<tc>} {
    tpu.enqueue_dma source(%arg0 : memref<2x1024xf32, #tpu.memory_space<any>>) target(%arg1 : memref<2x1024xf32, #tpu.memory_space<any>>) target_semaphore(%arg2 : memref<!tpu.dma_semaphore, #tpu.memory_space<semaphore_mem>>)
    tpu.wait_dma2 semaphore(%arg2 : memref<!tpu.dma_semaphore, #tpu.memory_space<semaphore_mem>>) src(%arg0 : memref<2x1024xf32, #tpu.memory_space<any>>) dst(%arg1 : memref<2x1024xf32, #tpu.memory_space<any>>)
    return
  }
}

</mosaic_0001>

<bundles_post_ra>
// kernel: tpu_custom_call.1
= control target key start
LH: loop header
LB: loop body
LE: loop exit
PB: predicated region body
PF: predicated region fallthrough
CT: control target
= control target key end

     0   :  { %s33_s12 = smov [#allocation2]   ;;  %s34_s13 = smov [#allocation3]   ;;  %s52_s0 = inlined_call_operand.hbm [shape: f32[2,1024], index: 0, kind: input, shape index: {}]   ;;  %s53_s1 = inlined_call_operand.hbm [shape: f32[2,1024], index: 1, kind: output, shape index: {}]  }
   0x1   :  { %s10_s8 = sshll.u32 %s52_s0, 4  ;;  %s12_s11 = sshll.u32 %s53_s1, 4  ;;  %s11_s8 = int_to_ptr.hbm [resolvable:$true] %s10_s8  ;;  %s13_s11 = int_to_ptr.hbm [resolvable:$true] %s12_s11 }
   0x2   :  { %s35_s14 = smov 0  }
   0x3   :  { %16 = dma.general %s11_s8, 256, %s13_s11, %s33_s12, %s34_s13, [#allocation4], %s35_s14, 0  }
   0x4   :  { %31 = dma.done.wait [#allocation2], 256 }
   0x5   :  { %32 = vsyncadd [#allocation2], 4294967040 }
   0x6   :  { %21 = vsyncmov [#allocation2] }
   0x9   :  { %s22_s15 = vpop.sfrf %21 }
   0xa   :  { %p27_p0 = scmp.ne.s32.totalorder %s22_s15, 0 }
   0xc   :  { %26 = shalt.err (%p27_p0)  }

</bundles_post_ra>
